<compile_context>
chip_gen: v7x
topology: tpu7x:2x2x1
jax: 0.10.0
libtpu: 0.0.40
codegen_flags: <defaults>
</compile_context>

<pallas_src>
import functools

import jax
import jax.numpy as jnp
from jax.experimental import pallas as pl
from jax.experimental.pallas import tpu as pltpu


def _round_up(x, m):
    return ((x + m - 1) // m) * m


def _hash_u32(x):
    """Cheap per-element uint32 finalizer hash (murmur/lowbias style)."""
    x = x ^ (x >> 16)
    x = x * jnp.uint32(0x7FEB352D)
    x = x ^ (x >> 15)
    x = x * jnp.uint32(0x846CA68B)
    x = x ^ (x >> 16)
    return x


def _prenet_fused_kernel(x_ref, *refs, p, seed, tm):
    """refs = (w0, b0, w1, b1, ..., o_ref). Weights bf16, biases f32."""
    o_ref = refs[-1]
    wb_refs = refs[:-1]
    n_layers = len(wb_refs) // 2

    drop_thresh = min(int(p * 4294967296.0), 4294967295)  # P(bits < thresh) = p
    keep_scale = 1.0 / (1.0 - p) if p < 1.0 else 0.0

    row0 = pl.program_id(0) * tm          # global row offset of this tile
    h = x_ref[...]                        # (tm, K) bf16

    for li in range(n_layers):            # static unroll over layers
        w = wb_refs[2 * li][...]          # (K, H)  bf16, resident in VMEM
        b = wb_refs[2 * li + 1][...]      # (1, H)  f32
        # MXU matmul, f32 accumulation
        y = jnp.dot(h.astype(jnp.bfloat16), w,
                    preferred_element_type=jnp.float32)
        # bias + ReLU in f32 on the VPU
        y = jnp.maximum(y + b, jnp.float32(0.0))

        if p > 0.0:
            out_w = y.shape[-1]
            rows = jax.lax.broadcasted_iota(jnp.int32, y.shape, 0) + row0
            cols = jax.lax.broadcasted_iota(jnp.int32, y.shape, 1)
            idx = (rows * out_w + cols).astype(jnp.uint32)
            layer_key = (seed * 0x9E3779B1 + (li + 1) * 0x85EBCA6B) & 0xFFFFFFFF
            bits = _hash_u32(idx ^ jnp.uint32(layer_key))
            keep = bits >= jnp.uint32(drop_thresh)        # direct uint compare
            y = jnp.where(keep, y * jnp.float32(keep_scale), jnp.float32(0.0))

        h = y

    o_ref[...] = h.astype(o_ref.dtype)


def prenet_forward(x, weights, biases, *, dropout, seed=0, max_rows_per_tile=1024):
    """x: (B, T, in_dim) -> (B, T, n_units). weights[i]: (in, out), biases[i]: (out,)."""
    B, T, in_dim = x.shape
    N = B * T
    H = weights[-1].shape[1]
    out_dtype = x.dtype

    # Tile the row axis: big tiles for large inputs, no waste for small ones.
    tm = min(max_rows_per_tile, _round_up(N, 8))
    Np = _round_up(N, tm)

    h = x.reshape(N, in_dim).astype(jnp.bfloat16)   # halve activation DMA bytes
    if Np != N:
        h = jnp.pad(h, ((0, Np - N), (0, 0)))

    operands = [h]
    in_specs = [pl.BlockSpec((tm, in_dim), lambda i: (i, 0))]
    for w, b in zip(weights, biases):
        K, Hl = w.shape
        operands.append(jnp.asarray(w, jnp.bfloat16))               # bf16 MXU operand
        operands.append(jnp.asarray(b, jnp.float32).reshape(1, Hl))  # f32 epilogue
        in_specs.append(pl.BlockSpec((K, Hl), lambda i: (0, 0)))     # resident
        in_specs.append(pl.BlockSpec((1, Hl), lambda i: (0, 0)))     # resident

    kernel = functools.partial(_prenet_fused_kernel,
                               p=float(dropout), seed=int(seed), tm=tm)
    out = pl.pallas_call(
        kernel,
        out_shape=jax.ShapeDtypeStruct((Np, H), out_dtype),
        grid=(Np // tm,),
        in_specs=in_specs,
        out_specs=pl.BlockSpec((tm, H), lambda i: (i, 0)),
        compiler_params=pltpu.CompilerParams(
            dimension_semantics=("parallel",)),  # row tiles independent (v7x megacore)
    )(*operands)
    return out[:N].reshape(B, T, H)


def init_prenet_params(key, in_dim, n_layers, n_units, dtype=jnp.float32):
    """Kaiming-uniform-ish init matching nn.Linear shapes (stored as (in, out))."""
    weights, biases = [], []
    for i in range(n_layers):
        fan_in = in_dim if i == 0 else n_units
        key, kw, kb = jax.random.split(key, 3)
        bound = 1.0 / jnp.sqrt(fan_in)
        w = jax.random.uniform(kw, (fan_in, n_units), dtype, -bound, bound)
        b = jax.random.uniform(kb, (n_units,), dtype, -bound, bound)
        weights.append(w)
        biases.append(b)
    return weights, biases


if __name__ == "__main__":
    # Small shapes consistent with the module: batch=2, seq=8, in_dim=32,
    # n_layers=2, n_units=32, dropout=0.5.
    B, T, IN_DIM = 2, 8, 32
    N_LAYERS, N_UNITS, DROPOUT = 2, 32, 0.5

    key = jax.random.PRNGKey(0)
    key, kx = jax.random.split(key)
    x = jax.random.normal(kx, (B, T, IN_DIM), dtype=jnp.float32)
    weights, biases = init_prenet_params(key, IN_DIM, N_LAYERS, N_UNITS)

    # Correctness check of the fused Linear+ReLU path (dropout disabled),
    # against a pure-JAX reference using the same bf16 matmul precision.
    h_ref = x.reshape(B * T, IN_DIM)
    for w, b in zip(weights, biases):
        y = jnp.dot(h_ref.astype(jnp.bfloat16), w.astype(jnp.bfloat16),
                    preferred_element_type=jnp.float32) + b.reshape(1, -1)
        h_ref = jnp.maximum(y, 0.0)
    out_nodrop = prenet_forward(x, weights, biases, dropout=0.0, seed=0)
    out_nodrop = jax.block_until_ready(out_nodrop)
    assert jnp.allclose(out_nodrop.reshape(B * T, N_UNITS), h_ref,
                        atol=2e-2, rtol=2e-2)

    # Full forward with dropout (always applied, as in the PyTorch module).
    out = prenet_forward(x, weights, biases, dropout=DROPOUT, seed=0)
    out = jax.block_until_ready(out)

    assert out.shape == (B, T, N_UNITS)
    assert out.dtype == jnp.float32
    assert bool(jnp.all(out >= 0.0))          # ReLU + dropout -> non-negative
    assert bool(jnp.all(jnp.isfinite(out)))

    print("KERNEL_OK")
</pallas_src>

<mosaic_0001>
module attributes {stable_mosaic.version = 11 : i64} {
  func.func @_prenet_fused_kernel(%arg0: i32, %arg1: memref<16x32xbf16, #tpu.memory_space<vmem>>, %arg2: memref<32x32xbf16, #tpu.memory_space<vmem>>, %arg3: memref<1x32xf32, #tpu.memory_space<vmem>>, %arg4: memref<32x32xbf16, #tpu.memory_space<vmem>>, %arg5: memref<1x32xf32, #tpu.memory_space<vmem>>, %arg6: memref<16x32xf32, #tpu.memory_space<vmem>>) attributes {dimension_semantics = [#tpu.dimension_semantics<parallel>], iteration_bounds = array<i64: 1>, scalar_prefetch = 0 : i64, scratch_operands = 0 : i64, tpu.core_type = #tpu.core_type<tc>, window_params = [{transform_indices = @transform_0, window_bounds = array<i64: 16, 32>}, {pipeline_mode = #tpu.pipeline_mode<synchronous>, transform_indices = @transform_1, window_bounds = array<i64: 32, 32>}, {pipeline_mode = #tpu.pipeline_mode<synchronous>, transform_indices = @transform_2, window_bounds = array<i64: 1, 32>}, {pipeline_mode = #tpu.pipeline_mode<synchronous>, transform_indices = @transform_3, window_bounds = array<i64: 32, 32>}, {pipeline_mode = #tpu.pipeline_mode<synchronous>, transform_indices = @transform_4, window_bounds = array<i64: 1, 32>}, {transform_indices = @transform_5, window_bounds = array<i64: 16, 32>}]} {
    %c0 = arith.constant 0 : index
    %c0_0 = arith.constant 0 : index
    %0 = vector.load %arg1[%c0, %c0_0] : memref<16x32xbf16, #tpu.memory_space<vmem>>, vector<16x32xbf16>
    %c0_1 = arith.constant 0 : index
    %c0_2 = arith.constant 0 : index
    %1 = vector.load %arg2[%c0_1, %c0_2] : memref<32x32xbf16, #tpu.memory_space<vmem>>, vector<32x32xbf16>
    %c0_3 = arith.constant 0 : index
    %c0_4 = arith.constant 0 : index
    %2 = vector.load %arg3[%c0_3, %c0_4] : memref<1x32xf32, #tpu.memory_space<vmem>>, vector<1x32xf32>
    %cst = arith.constant dense<0.000000e+00> : vector<16x32xf32>
    %3 = tpu.matmul %0, %1, %cst {dimension_numbers = #tpu.dot_dimension_numbers<[1], [0], [0], [1], [0, 0, 1, 1], [], []>} : vector<16x32xbf16>, vector<32x32xbf16>, vector<16x32xf32> -> vector<16x32xf32>
    %4 = vector.broadcast %2 : vector<1x32xf32> to vector<16x32xf32>
    %5 = arith.addf %3, %4 : vector<16x32xf32>
    %cst_5 = arith.constant 0.000000e+00 : f32
    %6 = vector.broadcast %cst_5 : f32 to vector<16x32xf32>
    %7 = arith.maximumf %5, %6 : vector<16x32xf32>
    %c0_6 = arith.constant 0 : index
    %c0_7 = arith.constant 0 : index
    %8 = vector.load %arg4[%c0_6, %c0_7] : memref<32x32xbf16, #tpu.memory_space<vmem>>, vector<32x32xbf16>
    %c0_8 = arith.constant 0 : index
    %c0_9 = arith.constant 0 : index
    %9 = vector.load %arg5[%c0_8, %c0_9] : memref<1x32xf32, #tpu.memory_space<vmem>>, vector<1x32xf32>
    %10 = arith.truncf %7 : vector<16x32xf32> to vector<16x32xbf16>
    %cst_10 = arith.constant dense<0.000000e+00> : vector<16x32xf32>
    %11 = tpu.matmul %10, %8, %cst_10 {dimension_numbers = #tpu.dot_dimension_numbers<[1], [0], [0], [1], [0, 0, 1, 1], [], []>} : vector<16x32xbf16>, vector<32x32xbf16>, vector<16x32xf32> -> vector<16x32xf32>
    %12 = vector.broadcast %9 : vector<1x32xf32> to vector<16x32xf32>
    %13 = arith.addf %11, %12 : vector<16x32xf32>
    %cst_11 = arith.constant 0.000000e+00 : f32
    %14 = vector.broadcast %cst_11 : f32 to vector<16x32xf32>
    %15 = arith.maximumf %13, %14 : vector<16x32xf32>
    %c0_12 = arith.constant 0 : index
    %c0_13 = arith.constant 0 : index
    %16 = vector.load %arg6[%c0_12, %c0_13] : memref<16x32xf32, #tpu.memory_space<vmem>>, vector<16x32xf32>
    tpu.vector_store %arg6[%c0_12, %c0_13], %15 {strides = array<i32>} : memref<16x32xf32, #tpu.memory_space<vmem>>, vector<16x32xf32>,
    return
  }
  func.func @transform_0(%arg0: i32) -> (i32, i32) {
    %c0_i32 = arith.constant 0 : i32
    %c0_i32_0 = arith.constant 0 : i32
    return %arg0, %c0_i32 : i32, i32
  }
  func.func @transform_1(%arg0: i32) -> (i32, i32) {
    %c0_i32 = arith.constant 0 : i32
    %c0_i32_0 = arith.constant 0 : i32
    %c0_i32_1 = arith.constant 0 : i32
    return %c0_i32, %c0_i32_0 : i32, i32
  }
  func.func @transform_2(%arg0: i32) -> (i32, i32) {
    %c0_i32 = arith.constant 0 : i32
    %c0_i32_0 = arith.constant 0 : i32
    %c0_i32_1 = arith.constant 0 : i32
    return %c0_i32, %c0_i32_0 : i32, i32
  }
  func.func @transform_3(%arg0: i32) -> (i32, i32) {
    %c0_i32 = arith.constant 0 : i32
    %c0_i32_0 = arith.constant 0 : i32
    %c0_i32_1 = arith.constant 0 : i32
    return %c0_i32, %c0_i32_0 : i32, i32
  }
  func.func @transform_4(%arg0: i32) -> (i32, i32) {
    %c0_i32 = arith.constant 0 : i32
    %c0_i32_0 = arith.constant 0 : i32
    %c0_i32_1 = arith.constant 0 : i32
    return %c0_i32, %c0_i32_0 : i32, i32
  }
  func.func @transform_5(%arg0: i32) -> (i32, i32) {
    %c0_i32 = arith.constant 0 : i32
    %c0_i32_0 = arith.constant 0 : i32
    return %arg0, %c0_i32 : i32, i32
  }
}

</mosaic_0001>

<bundles_post_ra>
// kernel: tpu_custom_call.1
= control target key start
LH: loop header
LB: loop body
LE: loop exit
PB: predicated region body
PF: predicated region fallthrough
CT: control target
= control target key end

     0   :  { %10 = vsyncpa [#allocation3], 0  ;;  %s484_s0 = inlined_call_operand.hbm [shape: bf16[16,32], index: 0, kind: input, shape index: {}]   ;;  %s485_s1 = inlined_call_operand.hbm [shape: bf16[32,32], index: 1, kind: input, shape index: {}]   ;;  %s486_s2 = inlined_call_operand.vmem [shape: f32[1,32], index: 2, kind: input, shape index: {}]   ;;  %s487_s3 = inlined_call_operand.hbm [shape: bf16[32,32], index: 3, kind: input, shape index: {}]   ;;  %s488_s4 = inlined_call_operand.vmem [shape: f32[1,32], index: 4, kind: input, shape index: {}]   ;;  %s489_s5 = inlined_call_operand.hbm [shape: f32[16,32], index: 5, kind: output, shape index: {}]  }
   0x1   :  { %11 = vsyncpa [#allocation6], 0 }
   0x2   :  { %12 = vsyncpa [#allocation4], 0  ;;  %s370_s18 = smov [#allocation5]   ;;  %s371_s20 = smov [#allocation2]  }
   0x3   :  { %s30_s19 = sshll.u32 %s370_s18, 4  ;;  %s18_s21 = sshll.u32 %s371_s20, 4  ;;  %s31_s19 = int_to_ptr.vmem [resolvable:$true] %s30_s19  ;;  %s410_s21 = int_to_ptr.vmem [resolvable:$true] %s18_s21 }
   0x4   :  { %s276_s24 = scalar_lea.hbm %s485_s1, 256 }
   0x5   :  { %p277_p0 = scmp.ne.s32.totalorder %s485_s1, %s276_s24  ;;  %p280_p1 = scmp.lt.u32.totalorder %s276_s24, %s485_s1 }
   0x7   :  { %p282_p2 = pnand %p280_p1, %p277_p0 }
   0x9   :  { %285 = shalt.err (!%p282_p2)
}
   0xa   :  { %s286_s29 = scalar_lea.vmem %s31_s19, 256  ;;  %p291_p4 = scmp.lt.s32.totalorder %s31_s19, %s31_s19 }
   0xb   :  { %p287_p3 = scmp.ne.s32.totalorder %s31_s19, %s286_s29  ;;  %p292_p5 = scmp.lt.s32.totalorder %s286_s29, %s286_s29 }
   0xd   :  { %p293_p6 = por %p292_p5, %p291_p4 }
   0xf   :  { %p294_p7 = pnand %p293_p6, %p287_p3 }
  0x11   :  { %297 = shalt.err (!%p294_p7)
}
  0x12   :  { %s372_s30 = smov 64   ;;  %s373_s6 = smov 4  }
  0x13   :  { %36 = dma.hbm_to_vmem [thread:$0]  %s485_s1, 256, %s31_s19, [#allocation6], %s372_s30, %s372_s30, %s373_s6  }
  0x14   :  { %s298_s11 = scalar_lea.hbm %s484_s0, 128 }
  0x15   :  { %p299_p8 = scmp.ne.s32.totalorder %s484_s0, %s298_s11  ;;  %p302_p9 = scmp.lt.u32.totalorder %s298_s11, %s484_s0 }
  0x17   :  { %p304_p10 = pnand %p302_p9, %p299_p8 }
  0x19   :  { %307 = shalt.err (!%p304_p10)
}
  0x1a   :  { %s308_s16 = scalar_lea.vmem %s410_s21, 128  ;;  %p313_p12 = scmp.lt.s32.totalorder %s410_s21, %s410_s21 }
  0x1b   :  { %p309_p11 = scmp.ne.s32.totalorder %s410_s21, %s308_s16  ;;  %p314_p13 = scmp.lt.s32.totalorder %s308_s16, %s308_s16 }
  0x1d   :  { %p315_p0 = por %p314_p13, %p313_p12 }
  0x1f   :  { %p316_p1 = pnand %p315_p0, %p309_p11 }
  0x21   :  { %319 = shalt.err (!%p316_p1)
}
  0x22   :  { %24 = dma.hbm_to_vmem [thread:$0]  %s484_s0, 128, %s410_s21, [#allocation3], %s372_s30, %s372_s30, %s373_s6  }
  0x23   :  { %s374_s18 = smov [#allocation7]   ;;  %s320_s23 = scalar_lea.hbm %s487_s3, 256 }
  0x24   :  { %s44_s19 = sshll.u32 %s374_s18, 4  ;;  %p321_p2 = scmp.ne.s32.totalorder %s487_s3, %s320_s23  ;;  %s45_s19 = int_to_ptr.vmem [resolvable:$true] %s44_s19 }
  0x25   :  { %p324_p3 = scmp.lt.u32.totalorder %s320_s23, %s487_s3 }
  0x27   :  { %p326_p4 = pnand %p324_p3, %p321_p2 }
  0x29   :  { %329 = shalt.err (!%p326_p4)
}
  0x2a   :  { %s330_s28 = scalar_lea.vmem %s45_s19, 256  ;;  %p335_p6 = scmp.lt.s32.totalorder %s45_s19, %s45_s19 }
  0x2b   :  { %p331_p5 = scmp.ne.s32.totalorder %s45_s19, %s330_s28  ;;  %p336_p7 = scmp.lt.s32.totalorder %s330_s28, %s330_s28 }
  0x2d   :  { %p337_p8 = por %p336_p7, %p335_p6 }
  0x2f   :  { %p338_p9 = pnand %p337_p8, %p331_p5 }
  0x31   :  { %341 = shalt.err (!%p338_p9)
}
  0x32   :  { %50 = dma.hbm_to_vmem [thread:$0]  %s487_s3, 256, %s45_s19, [#allocation6], %s372_s30, %s372_s30, %s373_s6  }
  0x33   :  { %364 = dma.done.wait [#allocation3], 128  }
  0x34   :  { %365 = vsyncadd [#allocation3], 4294967168 }
  0x35   :  { %366 = dma.done.wait [#allocation6], 512  }
  0x36   :  { %367 = vsyncadd [#allocation6], 4294966784  ;;  %v375_v0 = vmov 0.0   ;;  %vm376_vm0 = vmmov 0   ;;  %v271_v1 = vld [vmem:[#allocation5] sm:$0xff]   ;;  %v272_v2 = vld [vmem:[#allocation5 + $0x8] sm:$0xff]  }
  0x37   :  { %245 = vmatprep.subr.bf16.mxu0 %v375_v0  ;;  %249 = vmatprep.mubr.msk.bf16.mxu0 %vm376_vm0, %v375_v0  ;;  %v273_v3 = vld [vmem:[#allocation2] sm:$0xff]   ;;  %vm93_vm1 = vcmask 261120   ;;  %v274_v4 = vld [vmem:[#allocation7] sm:$0xff]   ;;  %s377_s7 = smov [#allocation8]  }
  0x38   :  { %253 = vmatprep.subr.bf16.mxu1 %v375_v0  ;;  %257 = vmatprep.mubr.msk.bf16.mxu1 %vm376_vm0, %v375_v0  ;;  %v275_v5 = vld [vmem:[#allocation7 + $0x8] sm:$0xff]  }
  0x39   :  { %246 = vmatpush3.bf16.msra.mxu0 %v271_v1  ;;  %254 = vmatpush3.bf16.msra.mxu1 %v274_v4  ;;  %v230_v6 = vld [vmem:[%s486_s2] ss:$0 sm:$0xff]  ;;  %s217_s2 = sshll.u32 %s377_s7, 4  ;;  %s218_s2 = int_to_ptr.vmem [resolvable:$true] %s217_s2 }
  0x3a   :  { %247 = vmatprep.subr.bf16.mxu0 %v375_v0  ;;  %255 = vmatprep.subr.bf16.mxu1 %v375_v0  ;;  %v235_v16 = vld [vmem:[%s488_s4] ss:$0 sm:$0xff]  ;;  %s342_s8 = scalar_lea.vmem %s218_s2, 256  ;;  %p347_p11 = scmp.lt.s32.totalorder %s218_s2, %s218_s2 }
  0x3b   :  { %p343_p10 = scmp.ne.s32.totalorder %s218_s2, %s342_s8  ;;  %p348_p12 = scmp.lt.s32.totalorder %s342_s8, %s342_s8 }
  0x3d   :  { %248 = vmatpush3.bf16.msra.mxu0 %v272_v2  ;;  %256 = vmatpush3.bf16.msra.mxu1 %v275_v5  ;;  %p349_p13 = por %p348_p12, %p347_p11 }
  0x3f   :  { %p350_p0 = pnand %p349_p13, %p343_p10 }
  0x40   :  { %250 = vmatmul.mubr.msk.bf16.vlgmr.msra.gmra.mrb[0].mxu0 %vm93_vm1, %v273_v3 }
 0x113   :  { %v131_v7 = vpop.f32.mrb[0].mxu0 }
 0x114   :  { %v132_v8 = vadd.f32 %v230_v6, %v131_v7  ;;  %v251_v9 = vpop.f32.mrb[1].mxu0 }
 0x115   :  { %v134_v10 = vpop.f32.mrb[2].mxu0 }
 0x116   :  { %v135_v11 = vadd.f32 %v230_v6, %v134_v10  ;;  %v252_v12 = vpop.f32.mrb[3].mxu0  ;;  %v138_v13 = vmax.f32 %v132_v8, 0.0 }
 0x118   :  { %v139_v14 = vmax.f32 %v135_v11, 0.0 }
 0x11a   :  { %v145_v15 = vpack.c.bf16 %v139_v14, %v138_v13 }
 0x11c   :  { %258 = vmatmul.mubr.msk.bf16.vlgmr.msra.gmra.mrb[0].mxu1 %vm93_vm1, %v145_v15 }
 0x1ef   :  { %v201_v17 = vpop.f32.mrb[0].mxu1 }
 0x1f0   :  { %v202_v18 = vadd.f32 %v235_v16, %v201_v17  ;;  %v259_v19 = vpop.f32.mrb[1].mxu1 }
 0x1f1   :  { %v204_v20 = vpop.f32.mrb[2].mxu1 }
 0x1f2   :  { %v208_v21 = vmax.f32 %v202_v18, 0.0  ;;  %v205_v22 = vadd.f32 %v235_v16, %v204_v20  ;;  %v260_v23 = vpop.f32.mrb[3].mxu1 }
 0x1f4   :  { %210 = vst.msk [vmem:[#allocation8] sm:$0xff] %vm93_vm1, %v208_v21  ;;  %v209_v24 = vmax.f32 %v205_v22, 0.0 }
 0x1f6   :  { %211 = vst.msk [vmem:[#allocation8 + $0x8] sm:$0xff] %vm93_vm1, %v209_v24 }
 0x1f7   :  { %353 = shalt.err (!%p350_p0)
}
 0x1f8   :  { %s354_s10 = scalar_lea.hbm %s489_s5, 256 }
 0x1f9   :  { %p355_p1 = scmp.ne.s32.totalorder %s489_s5, %s354_s10  ;;  %p358_p2 = scmp.lt.u32.totalorder %s354_s10, %s489_s5 }
 0x1fb   :  { %p360_p3 = pnand %p358_p2, %p355_p1 }
 0x1fd   :  { %363 = shalt.err (!%p360_p3)
}
 0x1fe   :  { %s378_s15 = smov 128   ;;  %s379_s16 = smov 8  }
 0x1ff   :  { %223 = dma.vmem_to_hbm [thread:$0]  %s218_s2, 256, %s489_s5, [#allocation4], %s378_s15, %s378_s15, %s379_s16  }
 0x200   :  { %368 = dma.done.wait [#allocation4], 256  }
 0x201   :  { %369 = vsyncadd [#allocation4], 4294967040 }
 0x202   :  { %227 = vsyncpa [#allocation3], 1 }
 0x203   :  { %228 = vsyncpa [#allocation6], 1 }
 0x204   :  { %229 = vsyncpa [#allocation4], 1 }

</bundles_post_ra>
